<compile_context>
chip_gen: v7x
topology: tpu7x:2x2x1
jax: 0.10.0
libtpu: 0.0.40
codegen_flags: <defaults>
</compile_context>

<pallas_src>
import functools

import jax
import jax.numpy as jnp
from jax.experimental import pallas as pl
from jax.experimental.pallas import tpu as pltpu


def _bn_kernel(gamma_ref, beta_ref, mean_ref, var_ref, x_ref, y_ref, *, eps):
    # Per-channel affine-normalization parameters, kept 2-D (C, 1) for TPU layout.
    gamma = gamma_ref[...].astype(jnp.float32)          # (C, 1)
    beta = beta_ref[...].astype(jnp.float32)            # (C, 1)
    mean = mean_ref[...].astype(jnp.float32)            # (C, 1)
    var = var_ref[...].astype(jnp.float32)              # (C, 1)

    inv_std = jax.lax.rsqrt(var + eps)                  # EUP, effectively free
    scale = gamma * inv_std                             # (C, 1)
    shift = beta - mean * scale                         # (C, 1)

    x = x_ref[...].astype(jnp.float32)                  # (Bt, C, Tt)
    y = x * scale[None, :, :] + shift[None, :, :]       # broadcast over batch & time
    y_ref[...] = y.astype(y_ref.dtype)


def _pick_time_tile(T: int) -> int:
    """Largest 128-multiple tile (<=2048) that divides T; else full T."""
    if T % 128 != 0:
        return T
    for cand in (2048, 1024, 512, 256, 128):
        if T % cand == 0:
            return cand
    return T


def _pick_batch_tile(B: int, C: int, t_tile: int, itemsize: int,
                     target_bytes: int = 2 << 20) -> int:
    """Largest divisor of B keeping one x block around ~target_bytes."""
    per_b = max(1, C * t_tile * itemsize)
    bt = max(1, min(B, target_bytes // per_b))
    while B % bt != 0:
        bt -= 1
    return bt


@functools.partial(jax.jit, static_argnames=("eps",))
def bn_forward(x, running_mean, running_var, weight=None, bias=None, *, eps=1e-5):
    """Pallas implementation of BN.forward (inference-mode BatchNorm1d).

    x:            (B, C, T)
    running_mean: (C,)
    running_var:  (C,)
    weight/bias:  (C,) affine params (default 1 / 0, matching nn.BatchNorm1d init)
    returns:      (B, C, T), same dtype as x
    """
    B, C, T = x.shape

    if weight is None:
        weight = jnp.ones((C,), jnp.float32)
    if bias is None:
        bias = jnp.zeros((C,), jnp.float32)

    # Per-channel params as (C, 1) slabs (2-D, full-extent blocks).
    gamma = weight.reshape(C, 1).astype(jnp.float32)
    beta = bias.reshape(C, 1).astype(jnp.float32)
    mean = running_mean.reshape(C, 1).astype(jnp.float32)
    var = running_var.reshape(C, 1).astype(jnp.float32)

    t_tile = _pick_time_tile(T)
    b_tile = _pick_batch_tile(B, C, t_tile, x.dtype.itemsize)
    grid = (B // b_tile, T // t_tile)

    param_spec = pl.BlockSpec((C, 1), lambda b, t: (0, 0))
    x_spec = pl.BlockSpec((b_tile, C, t_tile), lambda b, t: (b, 0, t))
    y_spec = pl.BlockSpec((b_tile, C, t_tile), lambda b, t: (b, 0, t))

    kernel = functools.partial(_bn_kernel, eps=float(eps))

    return pl.pallas_call(
        kernel,
        out_shape=jax.ShapeDtypeStruct((B, C, T), x.dtype),
        grid=grid,
        in_specs=[param_spec, param_spec, param_spec, param_spec, x_spec],
        out_specs=y_spec,
        compiler_params=pltpu.CompilerParams(
            dimension_semantics=("parallel", "parallel")),
    )(gamma, beta, mean, var, x)


if __name__ == "__main__":
    # Small deterministic example consistent with BatchNorm1d over (B, C, T).
    B, C, T = 2, 4, 16
    eps = 1e-5

    key = jax.random.PRNGKey(0)
    kx, km, kv, kw, kb = jax.random.split(key, 5)
    x = jax.random.normal(kx, (B, C, T), dtype=jnp.float32)
    running_mean = jax.random.normal(km, (C,), dtype=jnp.float32)
    running_var = jax.random.uniform(kv, (C,), dtype=jnp.float32, minval=0.5, maxval=2.0)
    weight = jax.random.normal(kw, (C,), dtype=jnp.float32)
    bias = jax.random.normal(kb, (C,), dtype=jnp.float32)

    y = bn_forward(x, running_mean, running_var, weight, bias, eps=eps)
    y = jax.block_until_ready(y)

    # Pure-JAX reference (inference-mode BatchNorm1d).
    ref = (x - running_mean[None, :, None]) / jnp.sqrt(running_var[None, :, None] + eps)
    ref = ref * weight[None, :, None] + bias[None, :, None]

    assert y.shape == (B, C, T)
    assert y.dtype == x.dtype
    assert jnp.allclose(y, ref, atol=1e-4, rtol=1e-4)

    print("KERNEL_OK")
</pallas_src>

<mosaic_0001>
module attributes {stable_mosaic.version = 11 : i64} {
  func.func @_bn_kernel(%arg0: i32, %arg1: i32, %arg2: memref<4x1xf32, #tpu.memory_space<vmem>>, %arg3: memref<4x1xf32, #tpu.memory_space<vmem>>, %arg4: memref<4x1xf32, #tpu.memory_space<vmem>>, %arg5: memref<4x1xf32, #tpu.memory_space<vmem>>, %arg6: memref<2x4x16xf32, #tpu.memory_space<vmem>>, %arg7: memref<2x4x16xf32, #tpu.memory_space<vmem>>) attributes {dimension_semantics = [#tpu.dimension_semantics<parallel>, #tpu.dimension_semantics<parallel>], iteration_bounds = array<i64: 1, 1>, scalar_prefetch = 0 : i64, scratch_operands = 0 : i64, tpu.core_type = #tpu.core_type<tc>, window_params = [{pipeline_mode = #tpu.pipeline_mode<synchronous>, transform_indices = @transform_0, window_bounds = array<i64: 4, 1>}, {pipeline_mode = #tpu.pipeline_mode<synchronous>, transform_indices = @transform_1, window_bounds = array<i64: 4, 1>}, {pipeline_mode = #tpu.pipeline_mode<synchronous>, transform_indices = @transform_2, window_bounds = array<i64: 4, 1>}, {pipeline_mode = #tpu.pipeline_mode<synchronous>, transform_indices = @transform_3, window_bounds = array<i64: 4, 1>}, {transform_indices = @transform_4, window_bounds = array<i64: 2, 4, 16>}, {transform_indices = @transform_5, window_bounds = array<i64: 2, 4, 16>}]} {
    %c0 = arith.constant 0 : index
    %c0_0 = arith.constant 0 : index
    %0 = vector.load %arg2[%c0, %c0_0] : memref<4x1xf32, #tpu.memory_space<vmem>>, vector<4x1xf32>
    %c0_1 = arith.constant 0 : index
    %c0_2 = arith.constant 0 : index
    %1 = vector.load %arg3[%c0_1, %c0_2] : memref<4x1xf32, #tpu.memory_space<vmem>>, vector<4x1xf32>
    %c0_3 = arith.constant 0 : index
    %c0_4 = arith.constant 0 : index
    %2 = vector.load %arg4[%c0_3, %c0_4] : memref<4x1xf32, #tpu.memory_space<vmem>>, vector<4x1xf32>
    %c0_5 = arith.constant 0 : index
    %c0_6 = arith.constant 0 : index
    %3 = vector.load %arg5[%c0_5, %c0_6] : memref<4x1xf32, #tpu.memory_space<vmem>>, vector<4x1xf32>
    %cst = arith.constant 9.99999974E-6 : f32
    %4 = vector.broadcast %cst : f32 to vector<4x1xf32>
    %5 = arith.addf %3, %4 : vector<4x1xf32>
    %6 = math.rsqrt %5 : vector<4x1xf32>
    %7 = arith.mulf %0, %6 : vector<4x1xf32>
    %8 = arith.mulf %2, %7 : vector<4x1xf32>
    %9 = arith.subf %1, %8 : vector<4x1xf32>
    %c0_7 = arith.constant 0 : index
    %c0_8 = arith.constant 0 : index
    %c0_9 = arith.constant 0 : index
    %10 = vector.load %arg6[%c0_7, %c0_8, %c0_9] : memref<2x4x16xf32, #tpu.memory_space<vmem>>, vector<2x4x16xf32>
    %11 = vector.shape_cast %7 : vector<4x1xf32> to vector<1x4x1xf32>
    %12 = vector.broadcast %11 : vector<1x4x1xf32> to vector<2x4x16xf32>
    %13 = arith.mulf %10, %12 : vector<2x4x16xf32>
    %14 = vector.shape_cast %9 : vector<4x1xf32> to vector<1x4x1xf32>
    %15 = vector.broadcast %14 : vector<1x4x1xf32> to vector<2x4x16xf32>
    %16 = arith.addf %13, %15 : vector<2x4x16xf32>
    %c0_10 = arith.constant 0 : index
    %c0_11 = arith.constant 0 : index
    %c0_12 = arith.constant 0 : index
    %17 = vector.load %arg7[%c0_10, %c0_11, %c0_12] : memref<2x4x16xf32, #tpu.memory_space<vmem>>, vector<2x4x16xf32>
    tpu.vector_store %arg7[%c0_10, %c0_11, %c0_12], %16 {strides = array<i32>} : memref<2x4x16xf32, #tpu.memory_space<vmem>>, vector<2x4x16xf32>,
    return
  }
  func.func @transform_0(%arg0: i32, %arg1: i32) -> (i32, i32) {
    %c0_i32 = arith.constant 0 : i32
    %c0_i32_0 = arith.constant 0 : i32
    %c0_i32_1 = arith.constant 0 : i32
    return %c0_i32, %c0_i32_0 : i32, i32
  }
  func.func @transform_1(%arg0: i32, %arg1: i32) -> (i32, i32) {
    %c0_i32 = arith.constant 0 : i32
    %c0_i32_0 = arith.constant 0 : i32
    %c0_i32_1 = arith.constant 0 : i32
    return %c0_i32, %c0_i32_0 : i32, i32
  }
  func.func @transform_2(%arg0: i32, %arg1: i32) -> (i32, i32) {
    %c0_i32 = arith.constant 0 : i32
    %c0_i32_0 = arith.constant 0 : i32
    %c0_i32_1 = arith.constant 0 : i32
    return %c0_i32, %c0_i32_0 : i32, i32
  }
  func.func @transform_3(%arg0: i32, %arg1: i32) -> (i32, i32) {
    %c0_i32 = arith.constant 0 : i32
    %c0_i32_0 = arith.constant 0 : i32
    %c0_i32_1 = arith.constant 0 : i32
    return %c0_i32, %c0_i32_0 : i32, i32
  }
  func.func @transform_4(%arg0: i32, %arg1: i32) -> (i32, i32, i32) {
    %c0_i32 = arith.constant 0 : i32
    %c0_i32_0 = arith.constant 0 : i32
    return %arg0, %c0_i32, %arg1 : i32, i32, i32
  }
  func.func @transform_5(%arg0: i32, %arg1: i32) -> (i32, i32, i32) {
    %c0_i32 = arith.constant 0 : i32
    %c0_i32_0 = arith.constant 0 : i32
    return %arg0, %c0_i32, %arg1 : i32, i32, i32
  }
}

</mosaic_0001>

<bundles_post_ra>
// kernel: bn_forward.1
= control target key start
LH: loop header
LB: loop body
LE: loop exit
PB: predicated region body
PF: predicated region fallthrough
CT: control target
= control target key end

     0   :  { %v96_v0 = vmov 0   ;;  %s160_s0 = inlined_call_operand.vmem [shape: f32[4,1], index: 0, kind: input, shape index: {}]   ;;  %s161_s1 = inlined_call_operand.vmem [shape: f32[4,1], index: 1, kind: input, shape index: {}]   ;;  %s162_s2 = inlined_call_operand.vmem [shape: f32[4,1], index: 2, kind: input, shape index: {}]   ;;  %s163_s3 = inlined_call_operand.vmem [shape: f32[4,1], index: 3, kind: input, shape index: {}]   ;;  %s164_s4 = inlined_call_operand.vmem [shape: f32[2,4,16], index: 4, kind: input, shape index: {}]   ;;  %s165_s5 = inlined_call_operand.hbm [shape: f32[2,4,16], index: 5, kind: output, shape index: {}]  }
   0x1   :  { %69 = vset.pattern.permute.xlu0 %v96_v0  ;;  %v24_v1 = vld [vmem:[%s163_s3] sm:$0xf] }
   0x2   :  { %v25_v2 = vadd.f32 1e-05, %v24_v1 }
   0x3   :  { %10 = vsyncpa [#allocation3], 0  ;;  %v21_v3 = vld [vmem:[%s160_s0] sm:$0xf]  ;;  %v31_v11 = vld [vmem:[%s164_s4 + $0x4] sm:$0xf] }
   0x4   :  { %70 = vrsqrt.f32 %v25_v2  ;;  %v23_v5 = vld [vmem:[%s162_s2] sm:$0xf]  ;;  %s97_s28 = smov [#allocation2]   ;;  %vm46_vm0 = vcmask 125952  }
   0x5   :  { %v22_v7 = vld [vmem:[%s161_s1] sm:$0xf]  ;;  %s54_s2 = sshll.u32 %s97_s28, 4  ;;  %s55_s2 = int_to_ptr.vmem [resolvable:$true] %s54_s2 }
   0x6   :  { %v30_v10 = vld [vmem:[%s164_s4] sm:$0xf]  ;;  %s72_s1 = scalar_lea.vmem %s55_s2, 128  ;;  %p77_p1 = scmp.lt.s32.totalorder %s55_s2, %s55_s2 }
   0x7   :  { %p73_p0 = scmp.ne.s32.totalorder %s55_s2, %s72_s1  ;;  %p78_p2 = scmp.lt.s32.totalorder %s72_s1, %s72_s1 }
   0x9   :  { %p79_p3 = por %p78_p2, %p77_p1 }
   0xb   :  { %p80_p4 = pnand %p79_p3, %p73_p0 }
   0xe   :  { %v71_v4 = vpop.eup %70 }
   0xf   :  { %v27_v6 = vmul.f32 %v71_v4, %v21_v3 }
  0x11   :  { %34 = vperm.xlu0 %69, %v27_v6   ;;  %v28_v8 = vmul.f32 %v27_v6, %v23_v5 }
  0x13   :  { %v29_v9 = vsub.f32 %v22_v7, %v28_v8 }
  0x15   :  { %41 = vperm.xlu0 %69, %v29_v9  }
  0x90   :  { %v35_v12 = vpop.permute.xlu0 %34 }
  0x91   :  { %v37_v13 = vmul.f32 %v35_v12, %v30_v10  ;;  %v38_v14 = vmul.f32 %v35_v12, %v31_v11 }
  0x94   :  { %v42_v15 = vpop.permute.xlu0 %41 }
  0x95   :  { %v44_v16 = vadd.f32 %v42_v15, %v37_v13  ;;  %v45_v17 = vadd.f32 %v42_v15, %v38_v14 }
  0x97   :  { %47 = vst.msk [vmem:[#allocation2] sm:$0xf] %vm46_vm0, %v44_v16  ;;  %48 = vst.msk [vmem:[#allocation2 + $0x4] sm:$0xf] %vm46_vm0, %v45_v17 }
  0x98   :  { %83 = shalt.err (!%p80_p4)
}
  0x99   :  { %s84_s30 = scalar_lea.hbm %s165_s5, 128 }
  0x9a   :  { %p85_p5 = scmp.ne.s32.totalorder %s165_s5, %s84_s30  ;;  %p88_p6 = scmp.lt.u32.totalorder %s84_s30, %s165_s5 }
  0x9c   :  { %p90_p7 = pnand %p88_p6, %p85_p5 }
  0x9e   :  { %93 = shalt.err (!%p90_p7)
}
  0x9f   :  { %s98_s10 = smov 64   ;;  %s99_s11 = smov 4  }
  0xa0   :  { %60 = dma.vmem_to_hbm [thread:$0]  %s55_s2, 128, %s165_s5, [#allocation3], %s98_s10, %s98_s10, %s99_s11  }
  0xa1   :  { %94 = dma.done.wait [#allocation3], 128  }
  0xa2   :  { %95 = vsyncadd [#allocation3], 4294967168 }
  0xa3   :  { %64 = vsyncpa [#allocation3], 1 }

</bundles_post_ra>
